<compile_context>
chip_gen: v7x
topology: tpu7x:2x2x1
jax: 0.10.0
libtpu: 0.0.40
codegen_flags: <defaults>
</compile_context>

<pallas_src>
import functools

import jax
import jax.numpy as jnp
from jax import lax
from jax.experimental import pallas as pl
from jax.experimental.pallas import tpu as pltpu

LANES = 128          # lane width (last dim of every tile)
ACC_SUBLANES = 8     # f32 accumulator sublane tile -> (8, 128) partial outputs


def _sublane_pack(dtype):
    """Rows-per-vreg packing for a dtype: f32->8, bf16->16, int8/fp8->32."""
    return max(8, 32 // jnp.dtype(dtype).itemsize)


def _tversky_sums_kernel(pred_ref, lab_ref, tp_ref, lsum_ref, psum_ref,
                         *, tm, chunk, n_chunks, valid_rows, steps_per_core):
    """Accumulates partial sums of l*p, l and p into (1, 8, 128) VMEM outputs."""
    c = pl.program_id(0)          # core-split axis ("parallel")
    i = pl.program_id(1)          # row-tile axis ("arbitrary", reduction)

    @pl.when(i == 0)
    def _():
        tp_ref[...] = jnp.zeros_like(tp_ref)
        lsum_ref[...] = jnp.zeros_like(lsum_ref)
        psum_ref[...] = jnp.zeros_like(psum_ref)

    tile_idx = c * steps_per_core + i     # logical tile id
    row0 = tile_idx * tm                  # first logical row of this tile

    def accumulate(masked):
        def chunk_body(k, carry):
            tp_a, l_a, p_a = carry
            r0 = pl.multiple_of(k * chunk, chunk)
            p = pred_ref[pl.ds(r0, chunk), :].astype(jnp.float32)
            l = lab_ref[pl.ds(r0, chunk), :].astype(jnp.float32)
            if masked:
                # Zero rows past the logical end (pipeline-padded or clamped
                # re-read data) BEFORE the multiply so garbage never enters
                # the sums.  Only compiled into the boundary-tile branch.
                gid = row0 + r0 + lax.broadcasted_iota(
                    jnp.int32, (chunk, LANES), 0)
                keep = gid < valid_rows
                p = jnp.where(keep, p, 0.0)
                l = jnp.where(keep, l, 0.0)
            # VPU-only partial reduction: (chunk,128) -> (chunk//8, 8, 128),
            # sum the leading axis into resident (8,128) accumulators.
            p3 = p.reshape(chunk // ACC_SUBLANES, ACC_SUBLANES, LANES)
            l3 = l.reshape(chunk // ACC_SUBLANES, ACC_SUBLANES, LANES)
            return (tp_a + jnp.sum(l3 * p3, axis=0),
                    l_a + jnp.sum(l3, axis=0),
                    p_a + jnp.sum(p3, axis=0))

        zeros = jnp.zeros((ACC_SUBLANES, LANES), jnp.float32)
        tp_a, l_a, p_a = lax.fori_loop(
            0, n_chunks, chunk_body, (zeros, zeros, zeros), unroll=True)
        tp_ref[0] += tp_a
        lsum_ref[0] += l_a
        psum_ref[0] += p_a

    # Only the boundary tile (and any clamped overhang tile of an odd
    # 2-core split) needs masking; every other step takes the mask-free path.
    needs_mask = row0 + tm > valid_rows

    @pl.when(jnp.logical_not(needs_mask))
    def _():
        accumulate(masked=False)

    @pl.when(needs_mask)
    def _():
        accumulate(masked=True)


def _reduce_sums(prediction, label):
    """Returns (sum(l*p), sum(l), sum(p)) as f32 scalars via a Pallas kernel."""
    pred_flat = prediction.reshape(-1)
    lab_flat = label.reshape(-1)
    n = pred_flat.shape[0]

    ip = jnp.dtype(prediction.dtype).itemsize
    il = jnp.dtype(label.dtype).itemsize
    pack = max(_sublane_pack(prediction.dtype), _sublane_pack(label.dtype))

    # Split off the tiny (< pack*128 element) tail and reduce it with plain
    # XLA; this avoids any host-side jnp.pad (which would re-materialize both
    # inputs in HBM and roughly double the traffic of an HBM-bound kernel).
    min_block = pack * LANES
    n_main = (n // min_block) * min_block
    n_tail = n - n_main

    if n_tail:
        p_t = pred_flat[n_main:].astype(jnp.float32)
        l_t = lab_flat[n_main:].astype(jnp.float32)
        tp_tail = jnp.sum(l_t * p_t)
        l_tail = jnp.sum(l_t)
        p_tail = jnp.sum(p_t)
    else:
        tp_tail = l_tail = p_tail = jnp.float32(0.0)

    if n_main == 0:
        # Input smaller than one (pack, 128) block: pure-XLA path.
        return tp_tail, l_tail, p_tail

    rows = n_main // LANES                    # multiple of `pack`
    pred2d = pred_flat[:n_main].reshape(rows, LANES)
    lab2d = lab_flat[:n_main].reshape(rows, LANES)

    # Row-tile sizing: target multi-MiB DMA per grid step so the ~0.35 us
    # per-step pipeline overhead is negligible, while staying inside the
    # per-generation scoped-VMEM budgets (v5e 16 MiB default, v7x 32/64 MiB).
    if max(ip, il) >= 4:
        row_block, tm_max = 512, 8192         # f32: 8 MiB of inputs per step
    else:
        row_block, tm_max = 1024, 16384       # bf16/int8: keep >= 4 MiB/step

    if rows <= row_block:
        tm = rows
        chunk = rows
    else:
        tm = min(tm_max, (rows // row_block) * row_block)
        chunk = row_block
    n_chunks = tm // chunk

    total_tiles = pl.cdiv(rows, tm)

    # v7x: split the row range across the two TensorCores with a leading
    # "parallel" axis; per-core partial accumulators are summed below.
    # Harmless (serialized) on single-core v5e/v6e; only enabled when the
    # split wastes at most a small fraction of a tile.
    use_split = total_tiles >= 2 and (total_tiles % 2 == 0 or total_tiles >= 16)
    num_cores = 2 if use_split else 1
    steps_per_core = pl.cdiv(total_tiles, num_cores)

    last_tile = total_tiles - 1
    if num_cores * steps_per_core == total_tiles:
        def tile_map(c, i):
            return (c * steps_per_core + i, 0)
    else:
        def tile_map(c, i):
            # Clamp the single overhanging tile of an odd split; the kernel
            # masks its (re-read) contribution to zero.
            return (jnp.minimum(c * steps_per_core + i, last_tile), 0)

    kernel = functools.partial(
        _tversky_sums_kernel, tm=tm, chunk=chunk, n_chunks=n_chunks,
        valid_rows=rows, steps_per_core=steps_per_core)

    acc_shape = jax.ShapeDtypeStruct((num_cores, ACC_SUBLANES, LANES),
                                     jnp.float32)
    acc_spec = pl.BlockSpec((1, ACC_SUBLANES, LANES), lambda c, i: (c, 0, 0))

    step_bytes = tm * LANES * (ip + il)                 # both inputs, 1 buffer
    vmem_limit = int(min(2 * step_bytes + (16 << 20), 48 << 20))

    tp_part, l_part, p_part = pl.pallas_call(
        kernel,
        out_shape=(acc_shape, acc_shape, acc_shape),
        grid_spec=pltpu.PrefetchScalarGridSpec(
            num_scalar_prefetch=0,
            grid=(num_cores, steps_per_core),
            in_specs=[
                pl.BlockSpec((tm, LANES), tile_map),
                pl.BlockSpec((tm, LANES), tile_map),
            ],
            out_specs=(acc_spec, acc_spec, acc_spec),
        ),
        compiler_params=pltpu.CompilerParams(
            dimension_semantics=("parallel", "arbitrary"),
            vmem_limit_bytes=vmem_limit),
        cost_estimate=pl.CostEstimate(
            flops=3 * n_main, transcendentals=0,
            bytes_accessed=n_main * (ip + il)
            + 3 * num_cores * ACC_SUBLANES * LANES * 4),
    )(pred2d, lab2d)

    # Final cross-lane/sublane reduction of three tiny partials (cheap XLA).
    return (jnp.sum(tp_part) + tp_tail,
            jnp.sum(l_part) + l_tail,
            jnp.sum(p_part) + p_tail)


@functools.partial(jax.jit, static_argnames=("alpha",))
def tversky_loss(prediction, label, *, alpha):
    """1 - tp / (tp + alpha*fn + (1-alpha)*fp), matching the torch module."""
    tp, sum_label, sum_pred = _reduce_sums(prediction, label)
    fn = sum_label - tp
    fp = sum_pred - tp
    # tn = N - (sum_label + fp) is computed by the torch Metric but unused by
    # TverskyLoss, so it is omitted from the hot path.
    tversky = tp / (tp + alpha * fn + (1.0 - alpha) * fp)
    return 1.0 - tversky


def tversky_loss_ref(prediction, label, alpha):
    p = prediction.reshape(-1).astype(jnp.float32)
    l = label.reshape(-1).astype(jnp.float32)
    tp = jnp.sum(l * p)
    fn = jnp.sum(l) - tp
    fp = jnp.sum(p) - tp
    return 1.0 - tp / (tp + alpha * fn + (1.0 - alpha) * fp)


if __name__ == "__main__":
    key = jax.random.PRNGKey(0)
    k1, k2, k3, k4 = jax.random.split(key, 4)
    alpha = 0.7

    # NCHW-shaped inputs as the PyTorch module would see from a segmentation net
    shape = (2, 4, 16, 16)
    prediction = jax.nn.sigmoid(jax.random.normal(k1, shape, dtype=jnp.float32))
    label = (jax.random.uniform(k2, shape) > 0.5).astype(jnp.float32)

    loss = tversky_loss(prediction, label, alpha=alpha)
    jax.block_until_ready(loss)
    ref = tversky_loss_ref(prediction, label, alpha)
    assert jnp.allclose(loss, ref, rtol=1e-5, atol=1e-5), (loss, ref)

    # Second small check: element count not a multiple of 1024 exercises the
    # no-pad wrapper tail path alongside the kernel.
    shape2 = (3, 5, 7, 11)
    prediction2 = jax.nn.sigmoid(jax.random.normal(k3, shape2, dtype=jnp.float32))
    label2 = (jax.random.uniform(k4, shape2) > 0.5).astype(jnp.float32)
    loss2 = tversky_loss(prediction2, label2, alpha=alpha)
    jax.block_until_ready(loss2)
    ref2 = tversky_loss_ref(prediction2, label2, alpha)
    assert jnp.allclose(loss2, ref2, rtol=1e-5, atol=1e-5), (loss2, ref2)

    print("KERNEL_OK")
</pallas_src>

<mosaic_0001>
module attributes {stable_mosaic.version = 11 : i64} {
  func.func @_tversky_sums_kernel(%arg0: i32, %arg1: i32, %arg2: memref<16x128xf32, #tpu.memory_space<vmem>>, %arg3: memref<16x128xf32, #tpu.memory_space<vmem>>, %arg4: memref<1x8x128xf32, #tpu.memory_space<vmem>>, %arg5: memref<1x8x128xf32, #tpu.memory_space<vmem>>, %arg6: memref<1x8x128xf32, #tpu.memory_space<vmem>>) attributes {dimension_semantics = [#tpu.dimension_semantics<parallel>, #tpu.dimension_semantics<arbitrary>], iteration_bounds = array<i64: 1, 1>, scalar_prefetch = 0 : i64, scratch_operands = 0 : i64, tpu.core_type = #tpu.core_type<tc>, window_params = [{transform_indices = @transform_0, window_bounds = array<i64: 16, 128>}, {transform_indices = @transform_1, window_bounds = array<i64: 16, 128>}, {transform_indices = @transform_2, window_bounds = array<i64: 1, 8, 128>}, {transform_indices = @transform_3, window_bounds = array<i64: 1, 8, 128>}, {transform_indices = @transform_4, window_bounds = array<i64: 1, 8, 128>}]} {
    %c0_i32 = arith.constant 0 : i32
    %0 = arith.cmpi eq, %arg1, %c0_i32 : i32
    %1 = arith.extui %0 : i1 to i32
    %c0_i32_0 = arith.constant 0 : i32
    %2 = arith.cmpi ne, %1, %c0_i32_0 : i32
    scf.if %2 {
      %cst = arith.constant 0.000000e+00 : f32
      %13 = vector.broadcast %cst : f32 to vector<1x8x128xf32>
      %c0 = arith.constant 0 : index
      %c0_5 = arith.constant 0 : index
      %c0_6 = arith.constant 0 : index
      %14 = vector.load %arg4[%c0, %c0_5, %c0_6] : memref<1x8x128xf32, #tpu.memory_space<vmem>>, vector<1x8x128xf32>
      tpu.vector_store %arg4[%c0, %c0_5, %c0_6], %13 {strides = array<i32>} : memref<1x8x128xf32, #tpu.memory_space<vmem>>, vector<1x8x128xf32>,
      %cst_7 = arith.constant 0.000000e+00 : f32
      %15 = vector.broadcast %cst_7 : f32 to vector<1x8x128xf32>
      %c0_8 = arith.constant 0 : index
      %c0_9 = arith.constant 0 : index
      %c0_10 = arith.constant 0 : index
      %16 = vector.load %arg5[%c0_8, %c0_9, %c0_10] : memref<1x8x128xf32, #tpu.memory_space<vmem>>, vector<1x8x128xf32>
      tpu.vector_store %arg5[%c0_8, %c0_9, %c0_10], %15 {strides = array<i32>} : memref<1x8x128xf32, #tpu.memory_space<vmem>>, vector<1x8x128xf32>,
      %cst_11 = arith.constant 0.000000e+00 : f32
      %17 = vector.broadcast %cst_11 : f32 to vector<1x8x128xf32>
      %c0_12 = arith.constant 0 : index
      %c0_13 = arith.constant 0 : index
      %c0_14 = arith.constant 0 : index
      %18 = vector.load %arg6[%c0_12, %c0_13, %c0_14] : memref<1x8x128xf32, #tpu.memory_space<vmem>>, vector<1x8x128xf32>
      tpu.vector_store %arg6[%c0_12, %c0_13, %c0_14], %17 {strides = array<i32>} : memref<1x8x128xf32, #tpu.memory_space<vmem>>, vector<1x8x128xf32>,
    } else {
    }
    %c1_i32 = arith.constant 1 : i32
    %3 = arith.muli %arg0, %c1_i32 : i32
    %4 = arith.addi %3, %arg1 : i32
    %c16_i32 = arith.constant 16 : i32
    %5 = arith.muli %4, %c16_i32 : i32
    %c16_i32_1 = arith.constant 16 : i32
    %6 = arith.addi %5, %c16_i32_1 : i32
    %c16_i32_2 = arith.constant 16 : i32
    %7 = arith.cmpi sgt, %6, %c16_i32_2 : i32
    %true = arith.constant true
    %8 = arith.xori %7, %true : i1
    %9 = arith.extui %8 : i1 to i32
    %c0_i32_3 = arith.constant 0 : i32
    %10 = arith.cmpi ne, %9, %c0_i32_3 : i32
    scf.if %10 {
      %cst = arith.constant 0.000000e+00 : f32
      %13 = vector.broadcast %cst : f32 to vector<8x128xf32>
      %c0_i32_5 = arith.constant 0 : i32
      %c16_i32_6 = arith.constant 16 : i32
      %14 = arith.muli %c0_i32_5, %c16_i32_6 : i32
      %15 = tpu.assume_multiple %14, 16 : i32
      %16 = arith.index_cast %15 : i32 to index
      %c0 = arith.constant 0 : index
      %17 = vector.load %arg2[%16, %c0] : memref<16x128xf32, #tpu.memory_space<vmem>>, vector<16x128xf32>
      %18 = arith.index_cast %15 : i32 to index
      %c0_7 = arith.constant 0 : index
      %19 = vector.load %arg3[%18, %c0_7] : memref<16x128xf32, #tpu.memory_space<vmem>>, vector<16x128xf32>
      %20 = vector.shape_cast %17 : vector<16x128xf32> to vector<2x8x128xf32>
      %21 = vector.shape_cast %19 : vector<16x128xf32> to vector<2x8x128xf32>
      %22 = arith.mulf %21, %20 : vector<2x8x128xf32>
      %cst_8 = arith.constant dense<0.000000e+00> : vector<8x128xf32>
      %23 = vector.multi_reduction <add>, %22, %cst_8 [0] : vector<2x8x128xf32> to vector<8x128xf32>
      %24 = arith.addf %13, %23 : vector<8x128xf32>
      %cst_9 = arith.constant dense<0.000000e+00> : vector<8x128xf32>
      %25 = vector.multi_reduction <add>, %21, %cst_9 [0] : vector<2x8x128xf32> to vector<8x128xf32>
      %26 = arith.addf %13, %25 : vector<8x128xf32>
      %cst_10 = arith.constant dense<0.000000e+00> : vector<8x128xf32>
      %27 = vector.multi_reduction <add>, %20, %cst_10 [0] : vector<2x8x128xf32> to vector<8x128xf32>
      %28 = arith.addf %13, %27 : vector<8x128xf32>
      %c1_i32_11 = arith.constant 1 : i32
      %c0_12 = arith.constant 0 : index
      %c0_13 = arith.constant 0 : index
      %c0_14 = arith.constant 0 : index
      %29 = vector.load %arg4[%c0_12, %c0_13, %c0_14] : memref<1x8x128xf32, #tpu.memory_space<vmem>>, vector<1x8x128xf32>
      %30 = vector.shape_cast %29 : vector<1x8x128xf32> to vector<8x128xf32>
      %31 = arith.addf %30, %24 : vector<8x128xf32>
      %c0_15 = arith.constant 0 : index
      %c0_16 = arith.constant 0 : index
      %c0_17 = arith.constant 0 : index
      %32 = vector.load %arg4[%c0_15, %c0_16, %c0_17] : memref<1x8x128xf32, #tpu.memory_space<vmem>>, vector<1x8x128xf32>
      %33 = vector.shape_cast %32 : vector<1x8x128xf32> to vector<8x128xf32>
      %34 = vector.shape_cast %31 : vector<8x128xf32> to vector<1x8x128xf32>
      tpu.vector_store %arg4[%c0_15, %c0_16, %c0_17], %34 {strides = array<i32>} : memref<1x8x128xf32, #tpu.memory_space<vmem>>, vector<1x8x128xf32>,
      %c0_18 = arith.constant 0 : index
      %c0_19 = arith.constant 0 : index
      %c0_20 = arith.constant 0 : index
      %35 = vector.load %arg5[%c0_18, %c0_19, %c0_20] : memref<1x8x128xf32, #tpu.memory_space<vmem>>, vector<1x8x128xf32>
      %36 = vector.shape_cast %35 : vector<1x8x128xf32> to vector<8x128xf32>
      %37 = arith.addf %36, %26 : vector<8x128xf32>
      %c0_21 = arith.constant 0 : index
      %c0_22 = arith.constant 0 : index
      %c0_23 = arith.constant 0 : index
      %38 = vector.load %arg5[%c0_21, %c0_22, %c0_23] : memref<1x8x128xf32, #tpu.memory_space<vmem>>, vector<1x8x128xf32>
      %39 = vector.shape_cast %38 : vector<1x8x128xf32> to vector<8x128xf32>
      %40 = vector.shape_cast %37 : vector<8x128xf32> to vector<1x8x128xf32>
      tpu.vector_store %arg5[%c0_21, %c0_22, %c0_23], %40 {strides = array<i32>} : memref<1x8x128xf32, #tpu.memory_space<vmem>>, vector<1x8x128xf32>,
      %c0_24 = arith.constant 0 : index
      %c0_25 = arith.constant 0 : index
      %c0_26 = arith.constant 0 : index
      %41 = vector.load %arg6[%c0_24, %c0_25, %c0_26] : memref<1x8x128xf32, #tpu.memory_space<vmem>>, vector<1x8x128xf32>
      %42 = vector.shape_cast %41 : vector<1x8x128xf32> to vector<8x128xf32>
      %43 = arith.addf %42, %28 : vector<8x128xf32>
      %c0_27 = arith.constant 0 : index
      %c0_28 = arith.constant 0 : index
      %c0_29 = arith.constant 0 : index
      %44 = vector.load %arg6[%c0_27, %c0_28, %c0_29] : memref<1x8x128xf32, #tpu.memory_space<vmem>>, vector<1x8x128xf32>
      %45 = vector.shape_cast %44 : vector<1x8x128xf32> to vector<8x128xf32>
      %46 = vector.shape_cast %43 : vector<8x128xf32> to vector<1x8x128xf32>
      tpu.vector_store %arg6[%c0_27, %c0_28, %c0_29], %46 {strides = array<i32>} : memref<1x8x128xf32, #tpu.memory_space<vmem>>, vector<1x8x128xf32>,
    } else {
    }
    %11 = arith.extui %7 : i1 to i32
    %c0_i32_4 = arith.constant 0 : i32
    %12 = arith.cmpi ne, %11, %c0_i32_4 : i32
    scf.if %12 {
      %cst = arith.constant 0.000000e+00 : f32
      %13 = vector.broadcast %cst : f32 to vector<8x128xf32>
      %c0_i32_5 = arith.constant 0 : i32
      %c16_i32_6 = arith.constant 16 : i32
      %14 = arith.muli %c0_i32_5, %c16_i32_6 : i32
      %15 = tpu.assume_multiple %14, 16 : i32
      %16 = arith.index_cast %15 : i32 to index
      %c0 = arith.constant 0 : index
      %17 = vector.load %arg2[%16, %c0] : memref<16x128xf32, #tpu.memory_space<vmem>>, vector<16x128xf32>
      %18 = arith.index_cast %15 : i32 to index
      %c0_7 = arith.constant 0 : index
      %19 = vector.load %arg3[%18, %c0_7] : memref<16x128xf32, #tpu.memory_space<vmem>>, vector<16x128xf32>
      %20 = arith.addi %5, %15 : i32
      %21 = tpu.iota {dimensions = array<i32: 0>} : vector<16x128xi32>
      %22 = vector.broadcast %20 : i32 to vector<16x128xi32>
      %23 = arith.addi %22, %21 : vector<16x128xi32>
      %c16_i32_8 = arith.constant 16 : i32
      %24 = vector.broadcast %c16_i32_8 : i32 to vector<16x128xi32>
      %25 = arith.cmpi slt, %23, %24 : vector<16x128xi32>
      %cst_9 = arith.constant 0.000000e+00 : f32
      %26 = vector.broadcast %cst_9 : f32 to vector<16x128xf32>
      %27 = arith.select %25, %17, %26 : vector<16x128xi1>, vector<16x128xf32>
      %cst_10 = arith.constant 0.000000e+00 : f32
      %28 = vector.broadcast %cst_10 : f32 to vector<16x128xf32>
      %29 = arith.select %25, %19, %28 : vector<16x128xi1>, vector<16x128xf32>
      %30 = vector.shape_cast %27 : vector<16x128xf32> to vector<2x8x128xf32>
      %31 = vector.shape_cast %29 : vector<16x128xf32> to vector<2x8x128xf32>
      %32 = arith.mulf %31, %30 : vector<2x8x128xf32>
      %cst_11 = arith.constant dense<0.000000e+00> : vector<8x128xf32>
      %33 = vector.multi_reduction <add>, %32, %cst_11 [0] : vector<2x8x128xf32> to vector<8x128xf32>
      %34 = arith.addf %13, %33 : vector<8x128xf32>
      %cst_12 = arith.constant dense<0.000000e+00> : vector<8x128xf32>
      %35 = vector.multi_reduction <add>, %31, %cst_12 [0] : vector<2x8x128xf32> to vector<8x128xf32>
      %36 = arith.addf %13, %35 : vector<8x128xf32>
      %cst_13 = arith.constant dense<0.000000e+00> : vector<8x128xf32>
      %37 = vector.multi_reduction <add>, %30, %cst_13 [0] : vector<2x8x128xf32> to vector<8x128xf32>
      %38 = arith.addf %13, %37 : vector<8x128xf32>
      %c1_i32_14 = arith.constant 1 : i32
      %c0_15 = arith.constant 0 : index
      %c0_16 = arith.constant 0 : index
      %c0_17 = arith.constant 0 : index
      %39 = vector.load %arg4[%c0_15, %c0_16, %c0_17] : memref<1x8x128xf32, #tpu.memory_space<vmem>>, vector<1x8x128xf32>
      %40 = vector.shape_cast %39 : vector<1x8x128xf32> to vector<8x128xf32>
      %41 = arith.addf %40, %34 : vector<8x128xf32>
      %c0_18 = arith.constant 0 : index
      %c0_19 = arith.constant 0 : index
      %c0_20 = arith.constant 0 : index
      %42 = vector.load %arg4[%c0_18, %c0_19, %c0_20] : memref<1x8x128xf32, #tpu.memory_space<vmem>>, vector<1x8x128xf32>
      %43 = vector.shape_cast %42 : vector<1x8x128xf32> to vector<8x128xf32>
      %44 = vector.shape_cast %41 : vector<8x128xf32> to vector<1x8x128xf32>
      tpu.vector_store %arg4[%c0_18, %c0_19, %c0_20], %44 {strides = array<i32>} : memref<1x8x128xf32, #tpu.memory_space<vmem>>, vector<1x8x128xf32>,
      %c0_21 = arith.constant 0 : index
      %c0_22 = arith.constant 0 : index
      %c0_23 = arith.constant 0 : index
      %45 = vector.load %arg5[%c0_21, %c0_22, %c0_23] : memref<1x8x128xf32, #tpu.memory_space<vmem>>, vector<1x8x128xf32>
      %46 = vector.shape_cast %45 : vector<1x8x128xf32> to vector<8x128xf32>
      %47 = arith.addf %46, %36 : vector<8x128xf32>
      %c0_24 = arith.constant 0 : index
      %c0_25 = arith.constant 0 : index
      %c0_26 = arith.constant 0 : index
      %48 = vector.load %arg5[%c0_24, %c0_25, %c0_26] : memref<1x8x128xf32, #tpu.memory_space<vmem>>, vector<1x8x128xf32>
      %49 = vector.shape_cast %48 : vector<1x8x128xf32> to vector<8x128xf32>
      %50 = vector.shape_cast %47 : vector<8x128xf32> to vector<1x8x128xf32>
      tpu.vector_store %arg5[%c0_24, %c0_25, %c0_26], %50 {strides = array<i32>} : memref<1x8x128xf32, #tpu.memory_space<vmem>>, vector<1x8x128xf32>,
      %c0_27 = arith.constant 0 : index
      %c0_28 = arith.constant 0 : index
      %c0_29 = arith.constant 0 : index
      %51 = vector.load %arg6[%c0_27, %c0_28, %c0_29] : memref<1x8x128xf32, #tpu.memory_space<vmem>>, vector<1x8x128xf32>
      %52 = vector.shape_cast %51 : vector<1x8x128xf32> to vector<8x128xf32>
      %53 = arith.addf %52, %38 : vector<8x128xf32>
      %c0_30 = arith.constant 0 : index
      %c0_31 = arith.constant 0 : index
      %c0_32 = arith.constant 0 : index
      %54 = vector.load %arg6[%c0_30, %c0_31, %c0_32] : memref<1x8x128xf32, #tpu.memory_space<vmem>>, vector<1x8x128xf32>
      %55 = vector.shape_cast %54 : vector<1x8x128xf32> to vector<8x128xf32>
      %56 = vector.shape_cast %53 : vector<8x128xf32> to vector<1x8x128xf32>
      tpu.vector_store %arg6[%c0_30, %c0_31, %c0_32], %56 {strides = array<i32>} : memref<1x8x128xf32, #tpu.memory_space<vmem>>, vector<1x8x128xf32>,
    } else {
    }
    return
  }
  func.func @transform_0(%arg0: i32, %arg1: i32) -> (i32, i32) {
    %c1_i32 = arith.constant 1 : i32
    %0 = arith.muli %arg0, %c1_i32 : i32
    %1 = arith.addi %0, %arg1 : i32
    %c0_i32 = arith.constant 0 : i32
    %c0_i32_0 = arith.constant 0 : i32
    return %1, %c0_i32 : i32, i32
  }
  func.func @transform_1(%arg0: i32, %arg1: i32) -> (i32, i32) {
    %c1_i32 = arith.constant 1 : i32
    %0 = arith.muli %arg0, %c1_i32 : i32
    %1 = arith.addi %0, %arg1 : i32
    %c0_i32 = arith.constant 0 : i32
    %c0_i32_0 = arith.constant 0 : i32
    return %1, %c0_i32 : i32, i32
  }
  func.func @transform_2(%arg0: i32, %arg1: i32) -> (i32, i32, i32) {
    %c0_i32 = arith.constant 0 : i32
    %c0_i32_0 = arith.constant 0 : i32
    %c0_i32_1 = arith.constant 0 : i32
    return %arg0, %c0_i32, %c0_i32_0 : i32, i32, i32
  }
  func.func @transform_3(%arg0: i32, %arg1: i32) -> (i32, i32, i32) {
    %c0_i32 = arith.constant 0 : i32
    %c0_i32_0 = arith.constant 0 : i32
    %c0_i32_1 = arith.constant 0 : i32
    return %arg0, %c0_i32, %c0_i32_0 : i32, i32, i32
  }
  func.func @transform_4(%arg0: i32, %arg1: i32) -> (i32, i32, i32) {
    %c0_i32 = arith.constant 0 : i32
    %c0_i32_0 = arith.constant 0 : i32
    %c0_i32_1 = arith.constant 0 : i32
    return %arg0, %c0_i32, %c0_i32_0 : i32, i32, i32
  }
}

</mosaic_0001>

<bundles_post_ra>
// kernel: tversky_loss.1
= control target key start
LH: loop header
LB: loop body
LE: loop exit
PB: predicated region body
PF: predicated region fallthrough
CT: control target
= control target key end

     0   :  { %s202_s0 = inlined_call_operand.vmem [shape: f32[16,128], index: 0, kind: input, shape index: {}]   ;;  %s203_s1 = inlined_call_operand.vmem [shape: f32[16,128], index: 1, kind: input, shape index: {}]   ;;  %s204_s4 = inlined_call_operand.vmem [shape: f32[1,8,128], index: 4, kind: output, shape index: {2}]   ;;  %s205_s3 = inlined_call_operand.vmem [shape: f32[1,8,128], index: 3, kind: output, shape index: {1}]   ;;  %s206_s2 = inlined_call_operand.vmem [shape: f32[1,8,128], index: 2, kind: output, shape index: {0}]  }
   0x1   :  { %v73_v0 = vld [vmem:[%s202_s0] sm:$0xff]  ;;  %v74_v1 = vld [vmem:[%s202_s0 + $0x8] sm:$0xff] }
   0x2   :  { %v75_v2 = vld [vmem:[%s203_s1] sm:$0xff]  ;;  %v76_v3 = vld [vmem:[%s203_s1 + $0x8] sm:$0xff]  ;;  %v83_v5 = vadd.f32 %v74_v1, %v73_v0 }
   0x3   :  { %v77_v4 = vmul.f32 %v75_v2, %v73_v0  ;;  %v78_v6 = vmul.f32 %v76_v3, %v74_v1  ;;  %v81_v7 = vadd.f32 %v76_v3, %v75_v2 }
   0x4   :  { %93 = vst [vmem:[%s204_s4] sm:$0xff] %v83_v5 }
   0x5   :  { %v79_v8 = vadd.f32 %v78_v6, %v77_v4  ;;  %90 = vst [vmem:[%s205_s3] sm:$0xff] %v81_v7 }
   0x7   :  { %87 = vst [vmem:[%s206_s2] sm:$0xff] %v79_v8 }

</bundles_post_ra>
